<compile_context>
chip_gen: v6e
topology: v6e:2x2x1
jax: 0.10.0
libtpu: 0.0.40
codegen_flags: <defaults>
</compile_context>

<pallas_src>
import math

import jax
import jax.numpy as jnp
from jax.experimental import pallas as pl
from jax.experimental.pallas import tpu as pltpu


def _drop_path_kernel(scale_ref, x_ref, o_ref):
    # scale_ref: (Bt, 1) f32 per-sample factor (0.0 or 1/keep_prob).
    # x_ref / o_ref: (Bt, Tn) lane-dense activation tile.
    o_ref[...] = x_ref[...] * scale_ref[...].astype(x_ref.dtype)


def _pick_lane_tile(n, bt, itemsize, target_block_bytes=4 << 20):
    """Lane-tile choice: full rows if they fit in the byte budget, else the
    largest multiple of 512 lanes under it (ragged edges are masked)."""
    cap_elems = max(128, target_block_bytes // max(bt * itemsize, 1))
    if n <= cap_elems:
        return n                                   # one contiguous row slab per block
    return max(512, (cap_elems // 512) * 512)      # large, lane-dense, unmasked stores


def _find_reshape_factor(B, N, sub):
    """Smallest R with (B*R) % sub == 0 and N % R == 0 (sublane densification)."""
    need = sub // math.gcd(B, sub)
    r = need
    while r <= N:
        if N % r == 0:
            return r
        r += need
    return 1


def drop_path(x, drop_prob: float = 0.0, training: bool = False, seed: int = 0):
    """DropPath forward. x: (B, ...) — per-sample stochastic depth."""
    if drop_prob == 0.0 or not training:
        return x
    keep_prob = 1.0 - float(drop_prob)

    B = x.shape[0]
    N = 1
    for d in x.shape[1:]:
        N *= d
    itemsize = jnp.dtype(x.dtype).itemsize

    # Per-sample mask/scale computed once in the wrapper (no in-kernel PRNG).
    # TODO(synk): plumb a jax.random key through the API instead of an int seed.
    key = jax.random.PRNGKey(seed)
    u = jax.random.uniform(key, (B,), dtype=jnp.float32)
    scale = jnp.floor(keep_prob + u) * jnp.float32(1.0 / keep_prob)  # 0.0 or 1/keep_prob

    # Sublane occupancy target per dtype: 8 rows f32, 16 bf16, 32 int8.
    sub = {4: 8, 2: 16, 1: 32}.get(itemsize, 8)

    # Small-batch densification: view (B, N) as (B*R, N//R), repeat scale R times.
    R = 1
    if B < sub and N > 1:
        R = _find_reshape_factor(B, N, sub)
    Brows = B * R
    Ncols = N // R

    x2 = x.reshape(Brows, Ncols)
    scale2 = (jnp.repeat(scale, R) if R > 1 else scale).reshape(Brows, 1)

    # Row (sublane) tile and lane tile. No padding: pl.cdiv + masked edge blocks.
    Bt = sub if Brows >= sub else Brows            # full-dim block allowed if Brows < sub
    Tn = _pick_lane_tile(Ncols, Bt, itemsize)
    grid = (pl.cdiv(Brows, Bt), pl.cdiv(Ncols, Tn))   # j (lanes) innermost / fastest

    out = pl.pallas_call(
        _drop_path_kernel,
        out_shape=jax.ShapeDtypeStruct((Brows, Ncols), x.dtype),
        grid_spec=pltpu.PrefetchScalarGridSpec(
            num_scalar_prefetch=0,
            grid=grid,
            in_specs=[
                pl.BlockSpec((Bt, 1), lambda i, j: (i, 0)),    # per-sample scales
                pl.BlockSpec((Bt, Tn), lambda i, j: (i, j)),   # activation tile
            ],
            out_specs=pl.BlockSpec((Bt, Tn), lambda i, j: (i, j)),
        ),
        compiler_params=pltpu.CompilerParams(
            dimension_semantics=("parallel", "parallel"),      # v7x: shard across 2 TCs
            vmem_limit_bytes=40 * 1024 * 1024,                 # safe on v5e/v6e/v7x
        ),
        cost_estimate=pl.CostEstimate(
            flops=Brows * Ncols,
            transcendentals=0,
            bytes_accessed=2 * Brows * Ncols * itemsize + Brows * 4,
        ),
    )(scale2, x2)

    return out.reshape(x.shape)


class DropPath:
    """Mirror of the PyTorch DropPath module."""

    def __init__(self, drop_prob=None):
        self.drop_prob = drop_prob
        self.training = True

    def __call__(self, x, seed: int = 0):
        p = 0.0 if self.drop_prob is None else float(self.drop_prob)
        return drop_path(x, p, self.training, seed=seed)


if __name__ == "__main__":
    key = jax.random.PRNGKey(0)
    x = jax.random.normal(key, (2, 4, 16, 16), dtype=jnp.float32)

    mod = DropPath(drop_prob=0.5)
    mod.training = True
    y = jax.block_until_ready(mod(x, seed=1234))

    # Sanity: every sample must be either all-zero or exactly x / keep_prob.
    keep_prob = 0.5
    ok = True
    for b in range(x.shape[0]):
        yb = y[b]
        if bool(jnp.all(yb == 0.0)):
            continue
        if not bool(jnp.allclose(yb, x[b] / keep_prob, rtol=1e-6, atol=1e-6)):
            ok = False

    # Non-divisible batch / tiny-feature shape exercises the masked-edge path.
    x3 = jax.random.normal(jax.random.PRNGKey(1), (3, 5, 7, 9), dtype=jnp.float32)
    y3 = jax.block_until_ready(drop_path(x3, 0.3, True, seed=7))
    kp3 = 0.7
    for b in range(x3.shape[0]):
        yb = y3[b]
        if bool(jnp.all(yb == 0.0)):
            continue
        if not bool(jnp.allclose(yb, x3[b] / kp3, rtol=1e-5, atol=1e-5)):
            ok = False

    # Eval / p=0 path must be identity.
    mod.training = False
    y_eval = jax.block_until_ready(mod(x))
    ok = ok and bool(jnp.array_equal(y_eval, x))

    print("KERNEL_OK" if ok else "KERNEL_MISMATCH")
</pallas_src>

<mosaic_0001>
module attributes {stable_mosaic.version = 11 : i64} {
  func.func @_drop_path_kernel(%arg0: i32, %arg1: i32, %arg2: memref<8x1xf32, #tpu.memory_space<vmem>>, %arg3: memref<8x256xf32, #tpu.memory_space<vmem>>, %arg4: memref<8x256xf32, #tpu.memory_space<vmem>>) attributes {dimension_semantics = [#tpu.dimension_semantics<parallel>, #tpu.dimension_semantics<parallel>], iteration_bounds = array<i64: 1, 1>, scalar_prefetch = 0 : i64, scratch_operands = 0 : i64, tpu.core_type = #tpu.core_type<tc>, window_params = [{transform_indices = @transform_0, window_bounds = array<i64: 8, 1>}, {transform_indices = @transform_1, window_bounds = array<i64: 8, 256>}, {transform_indices = @transform_2, window_bounds = array<i64: 8, 256>}]} {
    %c0 = arith.constant 0 : index
    %c0_0 = arith.constant 0 : index
    %0 = vector.load %arg3[%c0, %c0_0] : memref<8x256xf32, #tpu.memory_space<vmem>>, vector<8x256xf32>
    %c0_1 = arith.constant 0 : index
    %c0_2 = arith.constant 0 : index
    %1 = vector.load %arg2[%c0_1, %c0_2] : memref<8x1xf32, #tpu.memory_space<vmem>>, vector<8x1xf32>
    %2 = vector.broadcast %1 : vector<8x1xf32> to vector<8x256xf32>
    %3 = arith.mulf %0, %2 : vector<8x256xf32>
    %c0_3 = arith.constant 0 : index
    %c0_4 = arith.constant 0 : index
    %4 = vector.load %arg4[%c0_3, %c0_4] : memref<8x256xf32, #tpu.memory_space<vmem>>, vector<8x256xf32>
    tpu.vector_store %arg4[%c0_3, %c0_4], %3 {strides = array<i32>} : memref<8x256xf32, #tpu.memory_space<vmem>>, vector<8x256xf32>,
    return
  }
  func.func @transform_0(%arg0: i32, %arg1: i32) -> (i32, i32) {
    %c0_i32 = arith.constant 0 : i32
    %c0_i32_0 = arith.constant 0 : i32
    return %arg0, %c0_i32 : i32, i32
  }
  func.func @transform_1(%arg0: i32, %arg1: i32) -> (i32, i32) {
    %c0_i32 = arith.constant 0 : i32
    return %arg0, %arg1 : i32, i32
  }
  func.func @transform_2(%arg0: i32, %arg1: i32) -> (i32, i32) {
    %c0_i32 = arith.constant 0 : i32
    return %arg0, %arg1 : i32, i32
  }
}

</mosaic_0001>

<bundles_post_ra>
// kernel: tpu_custom_call.1
= control target key start
LH: loop header
LB: loop body
LE: loop exit
PB: predicated region body
PF: predicated region fallthrough
CT: control target
= control target key end

     0   :  { %7 = vsyncpa [#allocation3], 0  ;;  %s126_s0 = inlined_call_operand.vmem [shape: f32[8,1], index: 0, kind: input, shape index: {}]   ;;  %s127_s1 = inlined_call_operand.hbm [shape: f32[8,256], index: 1, kind: input, shape index: {}]   ;;  %s128_s2 = inlined_call_operand.hbm [shape: f32[8,256], index: 2, kind: output, shape index: {}]  }
   0x1   :  { %8 = vsyncpa [#allocation4], 0  ;;  %s99_s9 = smov [#allocation2]  }
   0x2   :  { %s17_s10 = sshll.u32 %s99_s9, 4  ;;  %s18_s10 = int_to_ptr.vmem [resolvable:$true] %s17_s10 }
   0x3   :  { %s63_s11 = scalar_lea.vmem %s18_s10, 256  ;;  %p68_p1 = scmp.lt.s32.totalorder %s18_s10, %s18_s10 }
   0x4   :  { %p64_p0 = scmp.ne.s32.totalorder %s18_s10, %s63_s11  ;;  %p69_p2 = scmp.lt.s32.totalorder %s63_s11, %s63_s11 }
   0x6   :  { %p70_p3 = por %p69_p2, %p68_p1 }
   0x8   :  { %p71_p4 = pnand %p70_p3, %p64_p0 }
   0xa   :  { %74 = shalt.err (!%p71_p4)
}
   0xb   :  { %20 = dma.hbm_to_vmem [thread:$0]  %s127_s1, 256, %s18_s10, [#allocation3]  }
   0xc   :  { %95 = dma.done.wait [#allocation3], 256  }
   0xd   :  { %96 = vsyncadd [#allocation3], 4294967040  ;;  %v100_v0 = vmov 0   ;;  %v26_v1 = vld [vmem:[%s126_s0] sm:$0xff]  ;;  %v25_v3 = vld [vmem:[#allocation2 + $0x8] sm:$0xff]  ;;  %s101_s16 = smov [#allocation5]  }
   0xe   :  { %54 = vset.pattern.permute.xlu0 %v100_v0  ;;  %v24_v2 = vld [vmem:[#allocation2] sm:$0xff]  ;;  %s42_s17 = sshll.u32 %s101_s16, 4  ;;  %s43_s17 = int_to_ptr.vmem [resolvable:$true] %s42_s17 }
   0xf   :  { %29 = vperm.xlu0 %54, %v26_v1   ;;  %s75_s1 = scalar_lea.vmem %s43_s17, 256  ;;  %p80_p6 = scmp.lt.s32.totalorder %s43_s17, %s43_s17 }
  0x10   :  { %p76_p5 = scmp.ne.s32.totalorder %s43_s17, %s75_s1  ;;  %p81_p7 = scmp.lt.s32.totalorder %s75_s1, %s75_s1 }
  0x12   :  { %p82_p8 = por %p81_p7, %p80_p6 }
  0x14   :  { %p83_p9 = pnand %p82_p8, %p76_p5 }
  0x8a   :  { %v30_v4 = vpop.permute.xlu0 %29 }
  0x8b   :  { %v32_v5 = vmul.f32 %v30_v4, %v24_v2  ;;  %v33_v6 = vmul.f32 %v30_v4, %v25_v3 }
  0x8d   :  { %34 = vst [vmem:[#allocation5] sm:$0xff] %v32_v5  ;;  %35 = vst [vmem:[#allocation5 + $0x8] sm:$0xff] %v33_v6 }
  0x8e   :  { %86 = shalt.err (!%p83_p9)
}
  0x8f   :  { %45 = dma.vmem_to_hbm [thread:$0]  %s43_s17, 256, %s128_s2, [#allocation4]  }
  0x90   :  { %97 = dma.done.wait [#allocation4], 256  }
  0x91   :  { %98 = vsyncadd [#allocation4], 4294967040 }
  0x92   :  { %49 = vsyncpa [#allocation3], 1 }
  0x93   :  { %50 = vsyncpa [#allocation4], 1 }

</bundles_post_ra>
